<compile_context>
chip_gen: v6e
topology: v6e:2x2x1
jax: 0.10.0
libtpu: 0.0.40
codegen_flags: <defaults>
</compile_context>

<pallas_src>
import math

import jax
import jax.numpy as jnp
from jax.experimental import pallas as pl
from jax.experimental.pallas import tpu as pltpu

_TARGET_BLOCK_BYTES = 4 * 1024 * 1024     # aim for >= ~4 MiB moved per grid step
_DEFAULT_PHYS_VMEM = 64 * 1024 * 1024     # conservative fallback = v7x per-core VMEM
_POOL_CHUNK_LANES = 512                   # f32 pooling accumulates in small lane chunks


def _round_up(x, m):
    return ((x + m - 1) // m) * m


def _physical_vmem_bytes():
    """Per-core VMEM capacity; falls back to the smallest current generation."""
    try:
        info = pltpu.get_tpu_info()
        cap = getattr(info, "vmem_capacity_bytes", None)
        if cap:
            return int(cap)
    except Exception:
        pass
    return _DEFAULT_PHYS_VMEM


def _vmem_plan():
    """Generation-aware (planning_budget, vmem_limit) in bytes.

    128 MiB parts (v5e/v6e) -> 64 MiB budget / 96 MiB limit;
     64 MiB parts (v7x)     -> 32 MiB budget / 48 MiB limit.
    """
    phys = _physical_vmem_bytes()
    return phys // 2, (phys * 3) // 4


def _sublane_multiple(dtype):
    itemsize = jnp.dtype(dtype).itemsize
    return 8 * max(1, 4 // itemsize)      # f32 -> 8, bf16 -> 16, int8/fp8 -> 32


def _padded_slab_bytes(C, lanes, dtype):
    """Physical VMEM footprint of one (C, lanes) slice after tile padding."""
    itemsize = jnp.dtype(dtype).itemsize
    return _round_up(C, _sublane_multiple(dtype)) * _round_up(lanes, 128) * itemsize


def _eca_conv_params(dim, gamma=2, b=1):
    """Same kernel-size logic as the PyTorch module __init__."""
    k = int(abs((math.log(dim, 2) + b) / gamma))
    kernel_size = k if k % 2 else k + 1
    return kernel_size, kernel_size // 2


def _reflect_conv(pooled, w_ref, b_ref, C, K, pad):
    """Conv1d(1->1, K, padding_mode='reflect') over the channel axis + bias.

    pooled: (B_TILE, C) float32.  Exact f32 taps, static-slice reflect padding;
    runs once per grid step on a tiny vector (off the streaming critical path).
    """
    if pad > 0:
        left = [pooled[:, pad - i:pad - i + 1] for i in range(pad)]
        right = [pooled[:, C - 2 - i:C - 1 - i] for i in range(pad)]
        padded = jnp.concatenate(left + [pooled] + right, axis=1)
    else:
        padded = pooled
    acc = w_ref[0] * padded[:, 0:C]
    for j in range(1, K):
        acc = acc + w_ref[j] * padded[:, j:j + C]
    return acc + b_ref[0]


def _make_fused_kernel(C, HW, K, pad):
    inv_hw = 1.0 / HW
    # Pool in <= ~16 chunks; each chunk is a static ref slice so the f32 upcast
    # transient is bounded by the chunk, never the whole block.
    chunk = min(HW, max(_POOL_CHUNK_LANES, _round_up(-(-HW // 16), 128)))
    n_full = HW // chunk
    rem = HW - n_full * chunk

    def kernel(x_ref, w_ref, b_ref, o_ref):
        bt = x_ref.shape[0]
        acc = jnp.zeros((bt, C), jnp.float32)
        for i in range(n_full):                           # static, small trip count
            xs = x_ref[:, :, i * chunk:(i + 1) * chunk]
            acc = acc + jnp.sum(xs.astype(jnp.float32), axis=2)
        if rem:
            xs = x_ref[:, :, n_full * chunk:]
            acc = acc + jnp.sum(xs.astype(jnp.float32), axis=2)
        pooled = acc * inv_hw
        gate = jax.nn.sigmoid(_reflect_conv(pooled, w_ref, b_ref, C, K, pad))
        # Apply the gate in the input dtype (no full-slab f32 copy).
        o_ref[...] = x_ref[...] * gate[:, :, None].astype(o_ref.dtype)

    return kernel


def _make_gate_kernel(C, HW, hw_tile, K, pad):
    inv_hw = 1.0 / HW
    ragged = (HW % hw_tile) != 0

    def kernel(x_ref, w_ref, b_ref, gate_ref, acc_ref):
        t = pl.program_id(1)
        last = pl.num_programs(1) - 1

        @pl.when(t == 0)
        def _():
            acc_ref[...] = jnp.zeros_like(acc_ref)

        if ragged:
            # Pay for the OOB-lane mask only on the final (partial) tile.
            @pl.when(t != last)
            def _():
                acc_ref[...] += jnp.sum(x_ref[...].astype(jnp.float32), axis=2)

            @pl.when(t == last)
            def _():
                x = x_ref[...].astype(jnp.float32)
                lane = jax.lax.broadcasted_iota(jnp.int32, x.shape, 2) + t * hw_tile
                acc_ref[...] += jnp.sum(jnp.where(lane < HW, x, 0.0), axis=2)
        else:
            acc_ref[...] += jnp.sum(x_ref[...].astype(jnp.float32), axis=2)

        @pl.when(t == last)
        def _():
            pooled = acc_ref[...] * inv_hw
            gate = jax.nn.sigmoid(_reflect_conv(pooled, w_ref, b_ref, C, K, pad))
            gate_ref[...] = gate[:, :, None]

    return kernel


def _apply_kernel(x_ref, gate_ref, o_ref):
    o_ref[...] = x_ref[...] * gate_ref[...].astype(o_ref.dtype)


def _choose_batch_tile(B, per_batch_bytes, budget_bytes):
    """Divisor of B whose double-buffered in+out blocks (~4x block bytes) fit the
    budget.  Prefers the smallest divisor reaching the per-step block target;
    when B >= 2 only divisors giving >= 2 grid steps are considered so the
    parallel axis can be split across TensorCores (v7x)."""
    divisors = [d for d in range(1, B + 1) if B % d == 0]
    if B >= 2:
        divisors = [d for d in divisors if B // d >= 2]
    fitting = [d for d in divisors if 4 * d * per_batch_bytes <= budget_bytes]
    if not fitting:
        return None
    for d in fitting:
        if d * per_batch_bytes >= _TARGET_BLOCK_BYTES:
            return d
    return fitting[-1]


def _choose_hw_tile(HW, C, b_tile, dtype, budget_bytes):
    """Lane-dense (multiple-of-128) spatial tile that fits the budget with
    padded-byte accounting.  128 is the smallest possible lane tile, so for
    pathological C even that may exceed the budget (compiler limit has slack)."""
    if HW <= 128:
        return HW
    per_128_bytes = 4 * b_tile * _padded_slab_bytes(C, 128, dtype)   # in+out, 2x buffered
    n128 = max(1, budget_bytes // max(1, per_128_bytes))
    return max(128, min(n128, HW // 128) * 128)


def eca_pallas(x, weight, bias, *, vmem_budget_bytes=None, vmem_limit_bytes=None):
    """x: (B, C, H, W) NCHW.  weight: (1, 1, K) Conv1d weight.  bias: (1,)."""
    B, C, H, W = x.shape
    K = weight.shape[-1]
    pad = K // 2
    HW = H * W
    itemsize = jnp.dtype(x.dtype).itemsize

    auto_budget, auto_limit = _vmem_plan()
    budget = auto_budget if vmem_budget_bytes is None else vmem_budget_bytes
    limit = auto_limit if vmem_limit_bytes is None else vmem_limit_bytes
    limit = max(limit, budget)

    w_flat = weight.reshape(-1).astype(jnp.float32)
    b_flat = bias.reshape(-1).astype(jnp.float32)
    x3 = x.reshape(B, C, HW)

    flops = 3 * B * C * HW + 2 * B * C * K
    transcendentals = B * C
    bytes_rw = 2 * B * C * HW * itemsize

    b_tile = _choose_batch_tile(B, _padded_slab_bytes(C, HW, x.dtype), budget)

    if b_tile is not None:
        # ---------- fused single pass: pool + gate + multiply (x read once) --
        nb = B // b_tile
        # TODO(synk): for B == 1 the fused grid has a single step; on v7x the
        # two-pass plan (parallel spatial tiles) could use both TensorCores.
        out = pl.pallas_call(
            _make_fused_kernel(C, HW, K, pad),
            out_shape=jax.ShapeDtypeStruct((B, C, HW), x.dtype),
            grid=(nb,),
            in_specs=[
                pl.BlockSpec((b_tile, C, HW), lambda b: (b, 0, 0)),
                pl.BlockSpec(memory_space=pltpu.MemorySpace.SMEM),  # conv weight (K,)
                pl.BlockSpec(memory_space=pltpu.MemorySpace.SMEM),  # conv bias (1,)
            ],
            out_specs=pl.BlockSpec((b_tile, C, HW), lambda b: (b, 0, 0)),
            compiler_params=pltpu.CompilerParams(
                dimension_semantics=("parallel",),
                vmem_limit_bytes=limit),
            cost_estimate=pl.CostEstimate(
                flops=flops, transcendentals=transcendentals,
                bytes_accessed=bytes_rw),
        )(x3, w_flat, b_flat)
        return out.reshape(B, C, H, W)

    # ---------- two-pass fallback: per-batch slab too large for VMEM ---------
    b_tile = _choose_batch_tile(B, _padded_slab_bytes(C, 128, x.dtype), budget) or 1
    hw_tile = _choose_hw_tile(HW, C, b_tile, x.dtype, budget)
    nb = B // b_tile
    nt = pl.cdiv(HW, hw_tile)

    # Pass 1: tiled global-average-pool reduction -> channel gate (B, C, 1).
    gate = pl.pallas_call(
        _make_gate_kernel(C, HW, hw_tile, K, pad),
        out_shape=jax.ShapeDtypeStruct((B, C, 1), jnp.float32),
        grid=(nb, nt),
        in_specs=[
            pl.BlockSpec((b_tile, C, hw_tile), lambda b, t: (b, 0, t)),
            pl.BlockSpec(memory_space=pltpu.MemorySpace.SMEM),
            pl.BlockSpec(memory_space=pltpu.MemorySpace.SMEM),
        ],
        out_specs=pl.BlockSpec((b_tile, C, 1), lambda b, t: (b, 0, 0)),
        scratch_shapes=[pltpu.VMEM((b_tile, C), jnp.float32)],
        compiler_params=pltpu.CompilerParams(
            dimension_semantics=("parallel", "arbitrary"),
            vmem_limit_bytes=limit),
        cost_estimate=pl.CostEstimate(
            flops=B * C * HW + 2 * B * C * K,
            transcendentals=transcendentals,
            bytes_accessed=B * C * HW * itemsize),
    )(x3, w_flat, b_flat)

    # Pass 2: lane-dense tiled broadcast multiply (both grid axes parallel).
    out = pl.pallas_call(
        _apply_kernel,
        out_shape=jax.ShapeDtypeStruct((B, C, HW), x.dtype),
        grid=(nb, nt),
        in_specs=[
            pl.BlockSpec((b_tile, C, hw_tile), lambda b, t: (b, 0, t)),
            pl.BlockSpec((b_tile, C, 1), lambda b, t: (b, 0, 0)),
        ],
        out_specs=pl.BlockSpec((b_tile, C, hw_tile), lambda b, t: (b, 0, t)),
        compiler_params=pltpu.CompilerParams(
            dimension_semantics=("parallel", "parallel"),
            vmem_limit_bytes=limit),
        cost_estimate=pl.CostEstimate(
            flops=B * C * HW, transcendentals=0,
            bytes_accessed=2 * B * C * HW * itemsize),
    )(x3, gate)
    return out.reshape(B, C, H, W)


def eca_reference(x, weight, bias):
    """Pure-JAX reference mirroring the PyTorch forward."""
    B, C, H, W = x.shape
    K = weight.shape[-1]
    pad = K // 2
    pooled = jnp.mean(x.astype(jnp.float32), axis=(2, 3))           # (B, C)
    padded = jnp.pad(pooled, ((0, 0), (pad, pad)), mode="reflect")
    w = weight.reshape(-1).astype(jnp.float32)
    conv = sum(w[j] * padded[:, j:j + C] for j in range(K)) + bias[0]
    gate = jax.nn.sigmoid(conv)                                     # (B, C)
    return x * gate[:, :, None, None].astype(x.dtype)


if __name__ == "__main__":
    key = jax.random.PRNGKey(0)
    kx1, kx2, kx3, kw, kb = jax.random.split(key, 5)

    # ECA for dim=16 -> Conv1d kernel_size=3, reflect padding 1.
    C = 16
    K, _ = _eca_conv_params(C)
    weight = jax.random.normal(kw, (1, 1, K), dtype=jnp.float32) * 0.5
    bias = jax.random.normal(kb, (1,), dtype=jnp.float32) * 0.1

    # Case 1: fused single-pass path (HW = 256, lane-dense, single pool chunk).
    x1 = jax.random.normal(kx1, (2, C, 16, 16), dtype=jnp.float32)
    out1 = jax.block_until_ready(eca_pallas(x1, weight, bias))
    ref1 = eca_reference(x1, weight, bias)
    assert out1.shape == x1.shape
    assert jnp.allclose(out1, ref1, atol=1e-5, rtol=1e-5), "fused path mismatch"

    # Case 2: fused path with chunked f32 pooling (HW = 1024 -> two 512-lane chunks).
    x2 = jax.random.normal(kx2, (2, C, 32, 32), dtype=jnp.float32)
    out2 = jax.block_until_ready(eca_pallas(x2, weight, bias))
    ref2 = eca_reference(x2, weight, bias)
    assert jnp.allclose(out2, ref2, atol=1e-5, rtol=1e-5), "chunked-pool path mismatch"

    # Case 3: two-pass fallback forced via a tiny planning budget, with a ragged
    # spatial extent (HW = 144 -> unmasked first tile + masked final tile).
    x3 = jax.random.normal(kx3, (2, C, 12, 12), dtype=jnp.float32)
    out3 = jax.block_until_ready(
        eca_pallas(x3, weight, bias, vmem_budget_bytes=32 * 1024))
    ref3 = eca_reference(x3, weight, bias)
    assert jnp.allclose(out3, ref3, atol=1e-5, rtol=1e-5), "two-pass path mismatch"

    print("KERNEL_OK")
</pallas_src>

<mosaic_0001>
module attributes {stable_mosaic.version = 11 : i64} {
  func.func @kernel(%arg0: i32, %arg1: memref<1x16x256xf32, #tpu.memory_space<vmem>>, %arg2: memref<3xf32, #tpu.memory_space<smem>>, %arg3: memref<1xf32, #tpu.memory_space<smem>>, %arg4: memref<1x16x256xf32, #tpu.memory_space<vmem>>) attributes {dimension_semantics = [#tpu.dimension_semantics<parallel>], iteration_bounds = array<i64: 2>, scalar_prefetch = 0 : i64, scratch_operands = 0 : i64, tpu.core_type = #tpu.core_type<tc>, window_params = [{transform_indices = @transform_0, window_bounds = array<i64: 1, 16, 256>}, {transform_indices = @transform_1, window_bounds = array<i64: 3>}, {transform_indices = @transform_2, window_bounds = array<i64: 1>}, {transform_indices = @transform_3, window_bounds = array<i64: 1, 16, 256>}]} {
    %cst = arith.constant 0.000000e+00 : f32
    %0 = vector.broadcast %cst : f32 to vector<1x16xf32>
    %c0 = arith.constant 0 : index
    %c0_0 = arith.constant 0 : index
    %c0_1 = arith.constant 0 : index
    %1 = vector.load %arg1[%c0, %c0_0, %c0_1] : memref<1x16x256xf32, #tpu.memory_space<vmem>>, vector<1x16x256xf32>
    %cst_2 = arith.constant dense<0.000000e+00> : vector<1x16xf32>
    %2 = vector.multi_reduction <add>, %1, %cst_2 [2] : vector<1x16x256xf32> to vector<1x16xf32>
    %3 = arith.addf %0, %2 : vector<1x16xf32>
    %cst_3 = arith.constant 3.906250e-03 : f32
    %4 = vector.broadcast %cst_3 : f32 to vector<1x16xf32>
    %5 = arith.mulf %3, %4 : vector<1x16xf32>
    %6 = vector.extract_strided_slice %5 {offsets = [0, 1], sizes = [1, 1], strides = [1, 1]} : vector<1x16xf32> to vector<1x1xf32>
    %7 = vector.extract_strided_slice %5 {offsets = [0, 14], sizes = [1, 1], strides = [1, 1]} : vector<1x16xf32> to vector<1x1xf32>
    %8 = tpu.concatenate %6, %5, %7 in 1 : vector<1x1xf32>, vector<1x16xf32>, vector<1x1xf32> -> vector<1x18xf32>
    %c0_4 = arith.constant 0 : index
    %9 = memref.load %arg2[%c0_4] : memref<3xf32, #tpu.memory_space<smem>>
    %10 = vector.extract_strided_slice %8 {offsets = [0, 0], sizes = [1, 16], strides = [1, 1]} : vector<1x18xf32> to vector<1x16xf32>
    %11 = vector.broadcast %9 : f32 to vector<1x16xf32>
    %12 = arith.mulf %11, %10 : vector<1x16xf32>
    %c1 = arith.constant 1 : index
    %13 = memref.load %arg2[%c1] : memref<3xf32, #tpu.memory_space<smem>>
    %14 = vector.extract_strided_slice %8 {offsets = [0, 1], sizes = [1, 16], strides = [1, 1]} : vector<1x18xf32> to vector<1x16xf32>
    %15 = vector.broadcast %13 : f32 to vector<1x16xf32>
    %16 = arith.mulf %15, %14 : vector<1x16xf32>
    %17 = arith.addf %12, %16 : vector<1x16xf32>
    %c2 = arith.constant 2 : index
    %18 = memref.load %arg2[%c2] : memref<3xf32, #tpu.memory_space<smem>>
    %19 = vector.extract_strided_slice %8 {offsets = [0, 2], sizes = [1, 16], strides = [1, 1]} : vector<1x18xf32> to vector<1x16xf32>
    %20 = vector.broadcast %18 : f32 to vector<1x16xf32>
    %21 = arith.mulf %20, %19 : vector<1x16xf32>
    %22 = arith.addf %17, %21 : vector<1x16xf32>
    %c0_5 = arith.constant 0 : index
    %23 = memref.load %arg3[%c0_5] : memref<1xf32, #tpu.memory_space<smem>>
    %24 = vector.broadcast %23 : f32 to vector<1x16xf32>
    %25 = arith.addf %22, %24 : vector<1x16xf32>
    %26 = arith.negf %25 : vector<1x16xf32>
    %27 = math.exp %26 : vector<1x16xf32>
    %cst_6 = arith.constant 1.000000e+00 : f32
    %28 = vector.broadcast %cst_6 : f32 to vector<1x16xf32>
    %29 = arith.addf %28, %27 : vector<1x16xf32>
    %30 = arith.divf %28, %29 : vector<1x16xf32>
    %c0_7 = arith.constant 0 : index
    %c0_8 = arith.constant 0 : index
    %c0_9 = arith.constant 0 : index
    %31 = vector.load %arg1[%c0_7, %c0_8, %c0_9] : memref<1x16x256xf32, #tpu.memory_space<vmem>>, vector<1x16x256xf32>
    %32 = vector.shape_cast %30 : vector<1x16xf32> to vector<1x16x1xf32>
    %33 = vector.broadcast %32 : vector<1x16x1xf32> to vector<1x16x256xf32>
    %34 = arith.mulf %31, %33 : vector<1x16x256xf32>
    %c0_10 = arith.constant 0 : index
    %c0_11 = arith.constant 0 : index
    %c0_12 = arith.constant 0 : index
    %35 = vector.load %arg4[%c0_10, %c0_11, %c0_12] : memref<1x16x256xf32, #tpu.memory_space<vmem>>, vector<1x16x256xf32>
    tpu.vector_store %arg4[%c0_10, %c0_11, %c0_12], %34 {strides = array<i32>} : memref<1x16x256xf32, #tpu.memory_space<vmem>>, vector<1x16x256xf32>,
    return
  }
  func.func @transform_0(%arg0: i32) -> (i32, i32, i32) {
    %c0_i32 = arith.constant 0 : i32
    %c0_i32_0 = arith.constant 0 : i32
    %c0_i32_1 = arith.constant 0 : i32
    return %arg0, %c0_i32, %c0_i32_0 : i32, i32, i32
  }
  func.func @transform_1(%arg0: i32) -> i32 {
    %c0_i32 = arith.constant 0 : i32
    %c0_i32_0 = arith.constant 0 : i32
    return %c0_i32 : i32
  }
  func.func @transform_2(%arg0: i32) -> i32 {
    %c0_i32 = arith.constant 0 : i32
    %c0_i32_0 = arith.constant 0 : i32
    return %c0_i32 : i32
  }
  func.func @transform_3(%arg0: i32) -> (i32, i32, i32) {
    %c0_i32 = arith.constant 0 : i32
    %c0_i32_0 = arith.constant 0 : i32
    %c0_i32_1 = arith.constant 0 : i32
    return %arg0, %c0_i32, %c0_i32_0 : i32, i32, i32
  }
}

</mosaic_0001>

<bundles_post_ra>
// kernel: tpu_custom_call.1
= control target key start
LH: loop header
LB: loop body
LE: loop exit
PB: predicated region body
PF: predicated region fallthrough
CT: control target
= control target key end

     0   :  { %s817_s0 = inlined_call_operand.hbm [shape: f32[2,16,256], index: 0, kind: input, shape index: {}]   ;;  %s818_s1 = inlined_call_operand.vmem [shape: f32[3], index: 1, kind: input, shape index: {}]   ;;  %s819_s2 = inlined_call_operand.<no memory space> [shape: f32[1], index: 2, kind: input, shape index: {}]   ;;  %s820_s3 = inlined_call_operand.hbm [shape: f32[2,16,256], index: 3, kind: output, shape index: {}]  }
   0x1   :  { %8 = sst [smem:[#allocation2]] %s819_s2 }
   0x2   :  { %9 = vsyncpa [#allocation4], 0 }
   0x3   :  { %11 = vsyncpa [#allocation4 + $0x1], 0 }
   0x4   :  { %12 = vsyncpa [#allocation6], 0 }
   0x5   :  { %13 = vsyncpa [#allocation5], 0 }
   0x6   :  { %15 = vsyncpa [#allocation5 + $0x1], 0  ;;  %s620_s14 = smov 0   ;;  %s622_s15 = smov 0  }
   0x7   :  { %s624_s16 = smov 0   ;;  %s626_s17 = smov 0  }
   0x8 LB: > { %s641_s2 = sadd.s32 4294967295, %s586_s17   ;;  %s387_s18 = sadd.s32 4294967294, %s586_s17   ;;  %s586_s17 = sphi %s626_s17, %s842_s17   ;;  %s582_s16 = sphi %s624_s16, %s841_s16   ;;  %s578_s15 = sphi %s622_s15, %s840_s15   ;;  %s574_s14 = sphi %s620_s14, %s839_s14  }
   0x9   : > { %s645_s19 = sadd.s32 1, %s586_s17   ;;  %s28_s20 = sadd.s32 1, %s582_s16 }
   0xa   : > { %s25_s21 = ssub.s32 %s586_s17, %s645_s19  ;;  %p35_p0 = scmp.ne.s32.totalorder %s582_s16, %s578_s15 }
   0xb   : > { %p26_p1 = scmp.eq.s32.totalorder %s25_s21, 0  ;;  %p36_p2 = scmp.eq.s32.totalorder %s586_s17, 0 }
   0xc   : > { %p41_p3 = scmp.ne.s32.totalorder %s578_s15, %s574_s14  ;;  %p822_p4 = scmp.eq.s32.totalorder %s641_s2, 0 }
   0xd   : > { %s657_s22 = scalar_select %p26_p1, %s582_s16, %s28_s20  }
   0xe   : > { %p659_p5 = por %p36_p2, %p35_p0  ;;  %p665_p6 = por %p822_p4, %p41_p3 }
   0xf   : > { %p107_p7 = scmp.eq.s32.totalorder %s641_s2, 1  ;;  %p113_p8 = scmp.eq.s32.totalorder %s387_s18, 1 }
  0x10   : > { %s826_s24 = scalar_select %p665_p6, 1, 0 }
  0x11   : > { %p388_p9 = scmp.ge.s32.totalorder %s586_s17, 1  ;;  %p120_p10 = scmp.lt.s32.totalorder %s586_s17, 3 }
  0x12   : > { %p672_p11 = por %p107_p7, %p35_p0  ;;  %p676_p12 = por %p113_p8, %p41_p3 }
  0x13   : > { %p680_p13 = pnand %p388_p9, %p120_p10  ;;  %s133_s30 = sshll.u32 %s818_s1, 4  ;;  %s134_s30 = int_to_ptr.vmem [resolvable:$true] %s133_s30 }
  0x14   : > { %s827_s25 = scalar_select %p672_p11, 1, 0 }
  0x15   : > { %s828_s26 = scalar_select %p676_p12, 1, 0 }
  0x16   : > { %s829_s27 = scalar_select %p680_p13, 1, 0 }
  0x17   : > { %p416_p1 = pneg %p680_p13  ;;  %p429_p2 = scmp.lt.s32.totalorder %s586_s17, 2 }
  0x18   : > { %s147_s5 = sand.u32 1, %s582_s16   ;;  %s475_s8 = scalar_lea.vmem %s134_s30, 16 }
  0x19   : > { %p693_p7 = pnand %p416_p1, %p822_p4  ;;  %p700_p3 = pnand %p429_p2, %p659_p5 }
  0x1a   : > { %s391_s7 = sshll.u32 %s147_s5, 5  ;;  %p476_p8 = scmp.ne.s32.totalorder %s134_s30, %s475_s8 }
  0x1b   : > { %p477_p9 = pneg %p693_p7  ;;  %p483_p12 = scmp.lt.s32.totalorder %s134_s30, %s134_s30 }
  0x1c   : > { %p484_p11 = scmp.lt.s32.totalorder %s475_s8, %s475_s8 }
  0x1d   : > { %p478_p10 = pnand %p477_p9, %p476_p8 }
  0x1e   : > { %p485_p1 = por %p484_p11, %p483_p12 }
  0x1f   : > { %p479_p0 = pneg %p478_p10 }
  0x21   : > { %p486_p4 = pnand %p485_p1, %p479_p0 }
  0x23   : > { %489 = shalt.err (!%p486_p4)
}
  0x24   : > { %s588_s9 = smov [#allocation7]   ;;  %s406_s10 = sshll.u32 %s586_s17, 9 }
  0x25   : > { %419 = dma.vmem_to_smem (!%p693_p7), %s134_s30, 16, %s588_s9, [#allocation6]  }
  0x26   : > { %s151_s11 = scalar_lea.vmem [#allocation3], %s391_s7  ;;  %s712_s20 = scalar_lea.hbm %s817_s0, %s406_s10 }
  0x27   : > { %s158_s12 = sshll.u32 %s151_s11, 4  ;;  %s716_s21 = scalar_lea.sflag [#allocation4], %s147_s5  ;;  %s714_s12 = int_to_ptr.vmem [resolvable:$true] %s158_s12 }
  0x28   : > { %s490_s23 = scalar_lea.hbm %s712_s20, 512  ;;  %p492_p5 = pneg %p700_p3 }
  0x29   : > { %p491_p4 = scmp.ne.s32.totalorder %s712_s20, %s490_s23  ;;  %s495_s30 = scalar_lea.hbm %s817_s0, 1024 }
  0x2a   : > { %p496_p0 = scmp.lt.s32.totalorder %s712_s20, %s817_s0  ;;  %p497_p2 = scmp.lt.s32.totalorder %s495_s30, %s490_s23 }
  0x2b   : > { %p493_p11 = pnand %p492_p5, %p491_p4 }
  0x2c   : > { %p498_p7 = por %p497_p2, %p496_p0 }
  0x2d   : > { %p494_p12 = pneg %p493_p11 }
  0x2f   : > { %p499_p8 = pnand %p498_p7, %p494_p12 }
  0x31   : > { %502 = shalt.err (!%p499_p8)
}
  0x32   : > { %s503_s5 = scalar_lea.vmem %s714_s12, 512  ;;  %s589_s8 = smov [#allocation3]  }
  0x33   : > { %p504_p9 = scmp.ne.s32.totalorder %s714_s12, %s503_s5  ;;  %s508_s9 = sshll.u32 %s589_s8, 4  ;;  %s509_s9 = int_to_ptr.vmem [resolvable:$false] %s508_s9 }
  0x34   : > { %s510_s10 = scalar_lea.vmem %s509_s9, 1024  ;;  %p511_p4 = scmp.lt.s32.totalorder %s714_s12, %s509_s9 }
  0x35   : > { %p506_p10 = pnand %p504_p9, %p492_p5  ;;  %p512_p11 = scmp.lt.s32.totalorder %s510_s10, %s503_s5 }
  0x37   : > { %p507_p1 = pneg %p506_p10  ;;  %p513_p6 = por %p512_p11, %p511_p4 }
  0x39   : > { %p514_p13 = pnand %p513_p6, %p507_p1 }
  0x3b   : > { %517 = shalt.err (!%p514_p13)
}
  0x3c   : > { %s590_s11 = smov 256   ;;  %s591_s13 = smov 16  }
  0x3d   : > { %423 = dma.hbm_to_vmem [thread:$0]  (!%p700_p3), %s712_s20, 512, %s714_s12, %s716_s21, %s590_s11, %s590_s11, %s591_s13  }
  0x3e   : > { %p832_p5 = scmp.ne.s32.totalorder %s829_s27, 0 }
  0x3f   : > { %s740_s18 = sand.u32 (!%p832_p5), 1, %s578_s15   ;;  %p833_p6 = scmp.ne.s32.totalorder (!%p832_p5), %s826_s24, 0 }
  0x40   : > { %170 = sbr.rel (%p832_p5) target bundleno = 519 (0x207), region = 32  ;;  %s395_s23 = sshll.u32 (!%p832_p5), %s740_s18, 5 }
  0x41   : > { %s173_s28 = scalar_lea.sflag (!%p832_p5), [#allocation4], %s740_s18  ;;  %s176_s29 = scalar_lea.vmem (!%p832_p5), [#allocation3], %s395_s23 }
  0x45   : > { %561 = dma.done.wait (%p833_p6), %s173_s28, 512  }
  0x46   : > { %563 = vsyncadd (%p833_p6), %s173_s28, 4294966784  ;;  %p834_p13 = scmp.eq.s32.totalorder %s641_s2, 0 }
  0x48   : > { %565 = dma.done.wait (%p834_p13), [#allocation6], 16   ;;  %p835_p3 = pmov %p834_p13 }
  0x4a   : > { %567 = vsyncadd (%p835_p3), [#allocation6], 4294967280 }
  0x4b   : > { %185 = sfence }
  0x4c   : > { %v754_v0 = vld [vmem:[%s176_s29] sm:$0xff]  ;;  %v756_v1 = vld [vmem:[%s176_s29 + $0x8] sm:$0xff]  ;;  %v758_v2 = vld [vmem:[%s176_s29 + $0x10] sm:$0xff]  ;;  %v220_v6 = vlaneseq  ;;  %s398_s24 = sld [smem:[#allocation7 + $0x1]]  ;;  %vm232_vm0 = vcmask 138312   ;;  %vm237_vm1 = vcmask 7168  }
  0x4d   : > { %v208_v3 = vadd.f32 %v756_v1, %v754_v0  ;;  %v207_v4 = vld [vmem:[%s176_s29 + $0x18] sm:$0xff]  ;;  %s399_s27 = sld [smem:[#allocation7 + $0x2]]  ;;  %vm239_vm2 = vcmask 138240   ;;  %s592_s6 = smov 127  }
  0x4e   : > { %v211_v5 = vadd.f32 %v207_v4, %v758_v2  ;;  %v221_v7 = vand.u32 127, %v220_v6  ;;  %v224_v9 = vshrl.u32 %v220_v6, 7  ;;  %s593_s12 = smov 126   ;;  %s241_s20 = sld [smem:[#allocation7]] }
  0x4f   : > { %209 = vadd.xlane.f32.xlu0 %v208_v3  ;;  %s260_s21 = sld [smem:[#allocation2]]  ;;  %s203_s30 = scalar_lea.vmem [#allocation8], %s395_s23 }
  0x50   : > { %v222_v8 = vadd.s32 4294967295, %v221_v7  ;;  %v227_v10 = vadd.s32 4294967287, %v221_v7  ;;  %v271_v38 = vsub.s32 1, %v224_v9  ;;  %s302_s4 = sshll.u32 %s203_s30, 4  ;;  %s407_s7 = sshll.u32 %s641_s2, 9  ;;  %s766_s4 = int_to_ptr.vmem [resolvable:$true] %s302_s4 }
  0x51   : > { %s771_s9 = scalar_lea.hbm %s820_s3, %s407_s7  ;;  %s289_s2 = scalar_lea.sflag [#allocation5], %s740_s18 }
  0x52   : > { %v225_v12 = vsub.s32 %v222_v8, %v224_v9  ;;  %v230_v14 = vsub.s32 %v227_v10, %v224_v9  ;;  %v245_v21 = vstv %s398_s24  ;;  %s518_s10 = scalar_lea.vmem %s766_s4, 512  ;;  %p836_p0 = scmp.ne.s32.totalorder %s827_s25, 0 }
  0x53   : > { %212 = vadd.xlane.f32.xlu0 %v211_v5  ;;  %v253_v25 = vstv %s399_s27  ;;  %p519_p12 = scmp.ne.s32.totalorder %s766_s4, %s518_s10  ;;  %s594_s11 = smov [#allocation8]  }
  0x54   : > { %v242_v27 = vstv %s241_s20  ;;  %s522_s13 = sshll.u32 %s594_s11, 4  ;;  %s523_s13 = int_to_ptr.vmem [resolvable:$false] %s522_s13 }
  0x55   : > { %v261_v31 = vstv %s260_s21  ;;  %p520_p2 = pnand %p519_p12, %p836_p0  ;;  %s524_s23 = scalar_lea.vmem %s523_s13, 1024 }
  0x56   : > { %p525_p8 = scmp.lt.s32.totalorder %s766_s4, %s523_s13  ;;  %p526_p9 = scmp.lt.s32.totalorder %s524_s23, %s518_s10 }
  0x57   : > { %p521_p7 = pneg %p520_p2 }
  0x58   : > { %p527_p10 = por %p526_p9, %p525_p8 }
  0x5a   : > { %p528_p1 = pnand %p527_p10, %p521_p7 }
  0xd8   : > { %v210_v11 = vpop.xlane.xlu0 %209 }
  0xd9   : > { %v216_v13 = vmul.f32 0.00390625, %v210_v11 }
  0xdb   : > { %v226_v17 = vrot.slane %v216_v13, %v225_v12 }
  0xdc   : > { %v213_v15 = vpop.xlane.xlu0 %212 }
  0xdd   : > { %v217_v16 = vmul.f32 0.00390625, %v213_v15 }
  0xdf   : > { %v231_v18 = vrot.slane %v217_v16, %v230_v14  ;;  %v235_v20 = vrot.slane %v217_v16, 5 }
  0xe1   : > { %v233_v19 = vsel %vm232_vm0, %v231_v18, %v226_v17 }
  0xe2   : > { %v238_v22 = vsel %vm237_vm1, %v216_v13, %v233_v19 }
  0xe3   : > { %v240_v23 = vsel %vm239_vm2, %v238_v22, %v235_v20 }
  0xe4   : > { %v246_v24 = vmul.f32 %v245_v21, %v240_v23  ;;  %v254_v26 = vmul.f32 %v253_v25, %v240_v23  ;;  %v243_v29 = vmul.f32 %v242_v27, %v240_v23 }
  0xe6   : > { %248 = vrot.lane.b32.xlu1 %v246_v24, %s592_s6 }
  0xea   : > { %256 = vrot.lane.b32.xlu1 %v254_v26, %s593_s12 }
 0x158   : > { %v249_v28 = vpop.permute.xlu1 %248 }
 0x159   : > { %v251_v30 = vadd.f32 %v249_v28, %v243_v29 }
 0x15c   : > { %v257_v32 = vpop.permute.xlu1 %256 }
 0x15d   : > { %v259_v33 = vadd.f32 %v257_v32, %v251_v30 }
 0x15f   : > { %v262_v34 = vadd.f32 %v261_v31, %v259_v33 }
 0x161   : > { %v400_v35 = vmul.f32 -1.442695, %v262_v34 }
 0x163   : > { %471 = vpow2.f32 %v400_v35 }
 0x170   : > { %v472_v36 = vpop.eup %471 }
 0x171   : > { %v266_v37 = vadd.f32 1.0, %v472_v36 }
 0x173   : > { %473 = vrcp.f32 %v266_v37 }
 0x180   : > { %v474_v39 = vpop.eup %473 }
 0x181   : > { %v272_v40 = vrot.slane %v474_v39, %v271_v38 }
 0x183   : > { %278 = vbcast.lane.b32.xlu1 %v272_v40, 264  ;;  %274 = vbcast.lane.b32.xlu0 %v272_v40, 256 }
 0x1f5   : > { %v279_v41 = vpop.permute.xlu1 %278  ;;  %v275_v42 = vpop.permute.xlu0 %274 }
 0x1f6   : > { %v282_v43 = vmul.f32 %v279_v41, %v758_v2  ;;  %v283_v44 = vmul.f32 %v279_v41, %v207_v4  ;;  %v280_v45 = vmul.f32 %v275_v42, %v754_v0  ;;  %v281_v46 = vmul.f32 %v275_v42, %v756_v1 }
 0x1f8   : > { %286 = vst [vmem:[%s203_s30 + $0x10] sm:$0xff] %v282_v43  ;;  %287 = vst [vmem:[%s203_s30 + $0x18] sm:$0xff] %v283_v44 }
 0x1f9   : > { %284 = vst [vmem:[%s203_s30] sm:$0xff] %v280_v45  ;;  %285 = vst [vmem:[%s203_s30 + $0x8] sm:$0xff] %v281_v46 }
 0x1fa   : > { %531 = shalt.err (!%p528_p1)
}
 0x1fb   : > { %s532_s28 = scalar_lea.hbm %s771_s9, 512  ;;  %s536_s27 = scalar_lea.hbm %s820_s3, 1024 }
 0x1fc   : > { %p533_p4 = scmp.ne.s32.totalorder %s771_s9, %s532_s28  ;;  %p537_p6 = scmp.lt.s32.totalorder %s771_s9, %s820_s3 }
 0x1fd   : > { %p538_p13 = scmp.lt.s32.totalorder %s536_s27, %s532_s28 }
 0x1fe   : > { %p534_p11 = pnand %p533_p4, %p836_p0 }
 0x1ff   : > { %p539_p3 = por %p538_p13, %p537_p6 }
 0x200   : > { %p535_p5 = pneg %p534_p11 }
 0x202   : > { %p540_p12 = pnand %p539_p3, %p535_p5 }
 0x204   : > { %543 = shalt.err (!%p540_p12)
}
 0x205   : > { %s595_s20 = smov 256   ;;  %s596_s21 = smov 16  }
 0x206   : > { %414 = dma.vmem_to_hbm [thread:$0]  (%p836_p0), %s766_s4, 512, %s771_s9, %s289_s2, %s595_s20, %s595_s20, %s596_s21  }
 0x207 PF: > { %s317_s30 = sand.u32 1, %s574_s14   ;;  %p837_p2 = scmp.ne.s32.totalorder %s828_s26, 0 }
 0x208   : > { %p838_p7 = scmp.ge.s32.totalorder %s586_s17, 2  ;;  %s318_s7 = scalar_lea.sflag [#allocation5], %s317_s30 }
 0x20a   : > { %p425_p8 = pnand %p838_p7, %p837_p2 }
 0x20c   : > { %p426_p9 = pneg %p425_p8 }
 0x20e   : > { %569 = dma.done.wait (%p426_p9), %s318_s7, 512  }
 0x20f   : > { %571 = vsyncadd (%p426_p9), %s318_s7, 4294966784  ;;  %p18_p10 = scmp.ge.s32.totalorder %s645_s19, 4   ;;  %s839_s14 = smov %s578_s15 }
 0x210   : > { %s840_s15 = smov %s582_s16  ;;  %s841_s16 = smov %s657_s22 }
 0x211   : > { %s842_s17 = smov %s645_s19  ;;  %20 = sbr.rel (!%p18_p10) target bundleno = 8 (0x8), region = 82 }
 0x216   :  { %323 = vsyncpa [#allocation4], 1 }
 0x217   :  { %325 = vsyncpa [#allocation4 + $0x1], 1 }
 0x218   :  { %326 = vsyncpa [#allocation5], 1 }
 0x219   :  { %328 = vsyncpa [#allocation5 + $0x1], 1 }
 0x21a   :  { %329 = vsyncpa [#allocation6], 1 }
 0x21b   :  { %331 = vsyncpa [#allocation6 + $0x1], 1 }

</bundles_post_ra>
